<compile_context>
chip_gen: v6e
topology: v6e:2x2x1
jax: 0.10.0
libtpu: 0.0.40
codegen_flags: <defaults>
</compile_context>

<pallas_src>
import math
import functools

import jax
import jax.numpy as jnp
from jax.experimental import pallas as pl
from jax.experimental.pallas import tpu as pltpu


MASK_VALUE = -1e30  # scores are f32; fine (use finfo.min if scores go bf16)


# ----------------------------------------------------------------------------
# In-kernel helpers (f32 math)
# ----------------------------------------------------------------------------
def _layer_norm(x, gamma, beta, eps=1e-5):
    mean = jnp.mean(x, axis=-1, keepdims=True)
    var = jnp.mean((x - mean) ** 2, axis=-1, keepdims=True)
    return (x - mean) * jax.lax.rsqrt(var + eps) * gamma + beta


# ----------------------------------------------------------------------------
# Fused decoder stack kernel.
# grid = (B, L): one batch element per outer step, layers run sequentially on
# the inner ("arbitrary") axis with the activation carried in VMEM scratch.
#
# refs: x (1,S,D) f32, wqkv (1,D,3D) bf16, bqkv (1,1,3D) f32,
#       wo (1,D,D) bf16, bo (1,1,D) f32, ln1_g/ln1_b (1,1,D) f32,
#       w1 (1,D,F) bf16, b1 (1,1,F) f32, w2 (1,F,D) bf16, b2 (1,1,D) f32,
#       ln2_g/ln2_b (1,1,D) f32, out (1,S,D) f32, acc scratch (S,D) f32
# ----------------------------------------------------------------------------
def decoder_stack_kernel(x_ref,
                         wqkv_ref, bqkv_ref, wo_ref, bo_ref,
                         ln1g_ref, ln1b_ref,
                         w1_ref, b1_ref, w2_ref, b2_ref,
                         ln2g_ref, ln2b_ref,
                         out_ref,
                         acc_ref,
                         *, num_heads):
    layer = pl.program_id(1)
    num_layers = pl.num_programs(1)

    @pl.when(layer == 0)
    def _():
        acc_ref[...] = x_ref[0]

    x = acc_ref[...]                               # (S, D) f32 carried activation
    S, D = x.shape
    H = num_heads
    dh = D // H
    scale = 1.0 / math.sqrt(dh)

    xb = x.astype(jnp.bfloat16)

    # --- fused QKV projection: one (S,D)x(D,3D) MXU push ---
    qkv = jnp.dot(xb, wqkv_ref[0],
                  preferred_element_type=jnp.float32) + bqkv_ref[0]   # (S, 3D)

    q = qkv[:, :D].reshape(S, H, dh)
    k = qkv[:, D:2 * D].reshape(S, H, dh)
    v = qkv[:, 2 * D:].reshape(S, H, dh)

    qh = jnp.transpose(q, (1, 0, 2)).astype(jnp.bfloat16)             # (H, S, dh)
    kh = jnp.transpose(k, (1, 0, 2)).astype(jnp.bfloat16)
    vh = jnp.transpose(v, (1, 0, 2)).astype(jnp.bfloat16)

    # --- batched attention over the head axis (no explicit k transpose) ---
    s = jnp.einsum('hqd,hkd->hqk', qh, kh,
                   preferred_element_type=jnp.float32) * scale        # (H, S, S)

    row = jax.lax.broadcasted_iota(jnp.int32, (S, S), 0)
    col = jax.lax.broadcasted_iota(jnp.int32, (S, S), 1)
    causal = (col <= row)[None, :, :]

    s = jnp.where(causal, s, MASK_VALUE)
    s = s - jnp.max(s, axis=-1, keepdims=True)
    p = jnp.exp(s)
    denom = jnp.sum(p, axis=-1, keepdims=True)
    p = p * pl.reciprocal(denom, approx=True)

    ctx = jnp.einsum('hqk,hkd->hqd', p.astype(jnp.bfloat16), vh,
                     preferred_element_type=jnp.float32)              # (H, S, dh)
    ctx = jnp.transpose(ctx, (1, 0, 2)).reshape(S, D)

    attn = jnp.dot(ctx.astype(jnp.bfloat16), wo_ref[0],
                   preferred_element_type=jnp.float32) + bo_ref[0]

    # --- residual + post-LN ---
    h1 = _layer_norm(x + attn, ln1g_ref[0], ln1b_ref[0])

    # --- FFN (ReLU) ---
    f = jnp.dot(h1.astype(jnp.bfloat16), w1_ref[0],
                preferred_element_type=jnp.float32) + b1_ref[0]
    f = jnp.maximum(f, 0.0)
    f = jnp.dot(f.astype(jnp.bfloat16), w2_ref[0],
                preferred_element_type=jnp.float32) + b2_ref[0]

    h2 = _layer_norm(h1 + f, ln2g_ref[0], ln2b_ref[0])

    acc_ref[...] = h2                              # carry to next layer

    @pl.when(layer == num_layers - 1)
    def _():
        out_ref[0] = h2


def decoder_stack(x, p, num_heads):
    B, S, D = x.shape
    L, _, F = p['w1'].shape

    def wspec(shape):  # per-layer (stacked) parameter block
        return pl.BlockSpec((1,) + shape, lambda b, l: (l, 0, 0))

    in_specs = [
        pl.BlockSpec((1, S, D), lambda b, l: (b, 0, 0)),    # x
        wspec((D, 3 * D)), wspec((1, 3 * D)),               # wqkv, bqkv
        wspec((D, D)), wspec((1, D)),                       # wo, bo
        wspec((1, D)), wspec((1, D)),                       # ln1 g/b
        wspec((D, F)), wspec((1, F)),                       # w1, b1
        wspec((F, D)), wspec((1, D)),                       # w2, b2
        wspec((1, D)), wspec((1, D)),                       # ln2 g/b
    ]

    kernel = functools.partial(decoder_stack_kernel, num_heads=num_heads)
    return pl.pallas_call(
        kernel,
        out_shape=jax.ShapeDtypeStruct((B, S, D), jnp.float32),
        grid_spec=pltpu.PrefetchScalarGridSpec(
            num_scalar_prefetch=0,
            grid=(B, L),
            in_specs=in_specs,
            out_specs=pl.BlockSpec((1, S, D), lambda b, l: (b, 0, 0)),
            scratch_shapes=[pltpu.VMEM((S, D), jnp.float32)],
        ),
        compiler_params=pltpu.CompilerParams(
            dimension_semantics=("parallel", "arbitrary"),
            vmem_limit_bytes=64 * 1024 * 1024),
    )(x,
      p['wqkv'], p['bqkv'], p['wo'], p['bo'],
      p['ln1_g'], p['ln1_b'],
      p['w1'], p['b1'], p['w2'], p['b2'],
      p['ln2_g'], p['ln2_b'])


# ----------------------------------------------------------------------------
# fc_out: (B, D) @ (D, n_steps*vocab) + bias, tiled over output columns.
# ----------------------------------------------------------------------------
def fc_out_kernel(x_ref, w_ref, b_ref, out_ref):
    out_ref[...] = (jnp.dot(x_ref[...].astype(jnp.bfloat16), w_ref[...],
                            preferred_element_type=jnp.float32)
                    + b_ref[0])


def fc_out(x_last, w, b, block_n=512):
    B, D = x_last.shape
    O = w.shape[1]
    if O % block_n != 0:
        block_n = O                      # small-vocab fallback: single block
    return pl.pallas_call(
        fc_out_kernel,
        out_shape=jax.ShapeDtypeStruct((B, O), jnp.float32),
        grid_spec=pltpu.PrefetchScalarGridSpec(
            num_scalar_prefetch=0,
            grid=(O // block_n,),
            in_specs=[
                pl.BlockSpec((B, D), lambda j: (0, 0)),
                pl.BlockSpec((D, block_n), lambda j: (0, j)),
                pl.BlockSpec((1, block_n), lambda j: (0, j)),
            ],
            out_specs=pl.BlockSpec((B, block_n), lambda j: (0, j)),
        ),
        compiler_params=pltpu.CompilerParams(
            dimension_semantics=("parallel",),
            vmem_limit_bytes=64 * 1024 * 1024),
    )(x_last, w, b)


# ----------------------------------------------------------------------------
# Full forward pass (embedding gather is glue in plain JAX)
# ----------------------------------------------------------------------------
def transformer_forward(tokens, params, config):
    B, S = tokens.shape
    x = (params['tok_emb'][tokens]
         + params['pos_emb'][:S][None, :, :]).astype(jnp.float32)
    x = decoder_stack(x, params, config['num_heads'])
    logits = fc_out(x[:, -1, :], params['fc_w'], params['fc_b'])
    return logits.reshape(-1, config['prediction_steps'], config['vocab_size'])


# ----------------------------------------------------------------------------
# Deterministic parameter init (synthetic weights, stacked per layer).
# Matmul weights stored in bf16 (MXU operands); biases / LN params in f32.
# ----------------------------------------------------------------------------
def init_params(config, key):
    V = config['vocab_size']
    D = config['embed_dim']
    F = config['ffn_dim']
    L = config['num_layers']
    P = config['prediction_steps']
    M = config['max_seq_len']

    ks = jax.random.split(key, 8)

    def w(k, shape, dtype=jnp.float32, scale=0.02):
        return (scale * jax.random.normal(k, shape)).astype(dtype)

    return {
        'tok_emb': w(ks[0], (V, D)),
        'pos_emb': w(ks[1], (M, D)),
        'wqkv': w(ks[2], (L, D, 3 * D), jnp.bfloat16),
        'bqkv': jnp.zeros((L, 1, 3 * D), jnp.float32),
        'wo': w(ks[3], (L, D, D), jnp.bfloat16),
        'bo': jnp.zeros((L, 1, D), jnp.float32),
        'ln1_g': jnp.ones((L, 1, D), jnp.float32),
        'ln1_b': jnp.zeros((L, 1, D), jnp.float32),
        'w1': w(ks[4], (L, D, F), jnp.bfloat16),
        'b1': jnp.zeros((L, 1, F), jnp.float32),
        'w2': w(ks[5], (L, F, D), jnp.bfloat16),
        'b2': jnp.zeros((L, 1, D), jnp.float32),
        'ln2_g': jnp.ones((L, 1, D), jnp.float32),
        'ln2_b': jnp.zeros((L, 1, D), jnp.float32),
        'fc_w': w(ks[6], (D, V * P), jnp.bfloat16),
        'fc_b': jnp.zeros((1, V * P), jnp.float32),
    }


# ----------------------------------------------------------------------------
if __name__ == "__main__":
    config = {
        'vocab_size': 50,
        'prediction_steps': 2,
        'embed_dim': 32,
        'ffn_dim': 64,
        'num_layers': 2,
        'num_heads': 4,
        'max_seq_len': 16,
    }
    B, S = 2, 8

    key = jax.random.PRNGKey(0)
    params = init_params(config, key)
    tokens = jax.random.randint(jax.random.PRNGKey(0), (B, S),
                                0, config['vocab_size'], dtype=jnp.int32)

    out = transformer_forward(tokens, params, config)
    out = jax.block_until_ready(out)

    assert out.shape == (B, config['prediction_steps'], config['vocab_size'])
    assert out.dtype == jnp.float32
    assert bool(jnp.all(jnp.isfinite(out)))
    print("KERNEL_OK")
</pallas_src>

<mosaic_0001>
module attributes {stable_mosaic.version = 11 : i64} {
  func.func @decoder_stack_kernel(%arg0: i32, %arg1: i32, %arg2: memref<1x8x32xf32, #tpu.memory_space<vmem>>, %arg3: memref<1x32x96xbf16, #tpu.memory_space<vmem>>, %arg4: memref<1x1x96xf32, #tpu.memory_space<vmem>>, %arg5: memref<1x32x32xbf16, #tpu.memory_space<vmem>>, %arg6: memref<1x1x32xf32, #tpu.memory_space<vmem>>, %arg7: memref<1x1x32xf32, #tpu.memory_space<vmem>>, %arg8: memref<1x1x32xf32, #tpu.memory_space<vmem>>, %arg9: memref<1x32x64xbf16, #tpu.memory_space<vmem>>, %arg10: memref<1x1x64xf32, #tpu.memory_space<vmem>>, %arg11: memref<1x64x32xbf16, #tpu.memory_space<vmem>>, %arg12: memref<1x1x32xf32, #tpu.memory_space<vmem>>, %arg13: memref<1x1x32xf32, #tpu.memory_space<vmem>>, %arg14: memref<1x1x32xf32, #tpu.memory_space<vmem>>, %arg15: memref<1x8x32xf32, #tpu.memory_space<vmem>>, %arg16: memref<8x32xf32, #tpu.memory_space<vmem>>) attributes {dimension_semantics = [#tpu.dimension_semantics<parallel>, #tpu.dimension_semantics<arbitrary>], iteration_bounds = array<i64: 2, 2>, scalar_prefetch = 0 : i64, scratch_operands = 1 : i64, tpu.core_type = #tpu.core_type<tc>, window_params = [{transform_indices = @transform_0, window_bounds = array<i64: 1, 8, 32>}, {transform_indices = @transform_1, window_bounds = array<i64: 1, 32, 96>}, {transform_indices = @transform_2, window_bounds = array<i64: 1, 1, 96>}, {transform_indices = @transform_3, window_bounds = array<i64: 1, 32, 32>}, {transform_indices = @transform_4, window_bounds = array<i64: 1, 1, 32>}, {transform_indices = @transform_5, window_bounds = array<i64: 1, 1, 32>}, {transform_indices = @transform_6, window_bounds = array<i64: 1, 1, 32>}, {transform_indices = @transform_7, window_bounds = array<i64: 1, 32, 64>}, {transform_indices = @transform_8, window_bounds = array<i64: 1, 1, 64>}, {transform_indices = @transform_9, window_bounds = array<i64: 1, 64, 32>}, {transform_indices = @transform_10, window_bounds = array<i64: 1, 1, 32>}, {transform_indices = @transform_11, window_bounds = array<i64: 1, 1, 32>}, {transform_indices = @transform_12, window_bounds = array<i64: 1, 1, 32>}, {transform_indices = @transform_13, window_bounds = array<i64: 1, 8, 32>}]} {
    %c0_i32 = arith.constant 0 : i32
    %0 = arith.cmpi eq, %arg1, %c0_i32 : i32
    %1 = arith.extui %0 : i1 to i32
    %c0_i32_0 = arith.constant 0 : i32
    %2 = arith.cmpi ne, %1, %c0_i32_0 : i32
    scf.if %2 {
      %c0_61 = arith.constant 0 : index
      %c0_62 = arith.constant 0 : index
      %c0_63 = arith.constant 0 : index
      %133 = vector.load %arg2[%c0_61, %c0_62, %c0_63] : memref<1x8x32xf32, #tpu.memory_space<vmem>>, vector<1x8x32xf32>
      %134 = vector.shape_cast %133 : vector<1x8x32xf32> to vector<8x32xf32>
      %c0_64 = arith.constant 0 : index
      %c0_65 = arith.constant 0 : index
      %135 = vector.load %arg16[%c0_64, %c0_65] : memref<8x32xf32, #tpu.memory_space<vmem>>, vector<8x32xf32>
      tpu.vector_store %arg16[%c0_64, %c0_65], %134 {strides = array<i32>} : memref<8x32xf32, #tpu.memory_space<vmem>>, vector<8x32xf32>,
    } else {
    }
    %c0 = arith.constant 0 : index
    %c0_1 = arith.constant 0 : index
    %3 = vector.load %arg16[%c0, %c0_1] : memref<8x32xf32, #tpu.memory_space<vmem>>, vector<8x32xf32>
    %4 = arith.truncf %3 : vector<8x32xf32> to vector<8x32xbf16>
    %c0_2 = arith.constant 0 : index
    %c0_3 = arith.constant 0 : index
    %c0_4 = arith.constant 0 : index
    %5 = vector.load %arg3[%c0_2, %c0_3, %c0_4] : memref<1x32x96xbf16, #tpu.memory_space<vmem>>, vector<1x32x96xbf16>
    %6 = vector.shape_cast %5 : vector<1x32x96xbf16> to vector<32x96xbf16>
    %cst = arith.constant dense<0.000000e+00> : vector<8x96xf32>
    %7 = tpu.matmul %4, %6, %cst {dimension_numbers = #tpu.dot_dimension_numbers<[1], [0], [0], [1], [0, 0, 1, 1], [], []>} : vector<8x32xbf16>, vector<32x96xbf16>, vector<8x96xf32> -> vector<8x96xf32>
    %c0_5 = arith.constant 0 : index
    %c0_6 = arith.constant 0 : index
    %c0_7 = arith.constant 0 : index
    %8 = vector.load %arg4[%c0_5, %c0_6, %c0_7] : memref<1x1x96xf32, #tpu.memory_space<vmem>>, vector<1x1x96xf32>
    %9 = vector.shape_cast %8 : vector<1x1x96xf32> to vector<1x96xf32>
    %10 = vector.broadcast %9 : vector<1x96xf32> to vector<8x96xf32>
    %11 = arith.addf %7, %10 : vector<8x96xf32>
    %12 = vector.extract_strided_slice %11 {offsets = [0, 0], sizes = [8, 32], strides = [1, 1]} : vector<8x96xf32> to vector<8x32xf32>
    %13 = vector.shape_cast %12 : vector<8x32xf32> to vector<8x4x8xf32>
    %14 = vector.extract_strided_slice %11 {offsets = [0, 32], sizes = [8, 32], strides = [1, 1]} : vector<8x96xf32> to vector<8x32xf32>
    %15 = vector.shape_cast %14 : vector<8x32xf32> to vector<8x4x8xf32>
    %16 = vector.extract_strided_slice %11 {offsets = [0, 64], sizes = [8, 32], strides = [1, 1]} : vector<8x96xf32> to vector<8x32xf32>
    %17 = vector.shape_cast %16 : vector<8x32xf32> to vector<8x4x8xf32>
    %18 = tpu.transpose %13, [1, 0, 2] : vector<8x4x8xf32> -> vector<4x8x8xf32>
    %19 = arith.truncf %18 : vector<4x8x8xf32> to vector<4x8x8xbf16>
    %20 = tpu.transpose %15, [1, 0, 2] : vector<8x4x8xf32> -> vector<4x8x8xf32>
    %21 = arith.truncf %20 : vector<4x8x8xf32> to vector<4x8x8xbf16>
    %22 = tpu.transpose %17, [1, 0, 2] : vector<8x4x8xf32> -> vector<4x8x8xf32>
    %23 = arith.truncf %22 : vector<4x8x8xf32> to vector<4x8x8xbf16>
    "tpu.trace_start"() <{level = 10 : i32, message = "hqd,hkd->hqk"}> : () -> ()
    %cst_8 = arith.constant dense<0.000000e+00> : vector<4x8x8xf32>
    %24 = tpu.matmul %19, %21, %cst_8 {dimension_numbers = #tpu.dot_dimension_numbers<[2], [2], [1], [1], [0, 0, 0, 1, 1, 1], [0], [0]>} : vector<4x8x8xbf16>, vector<4x8x8xbf16>, vector<4x8x8xf32> -> vector<4x8x8xf32>
    "tpu.trace_stop"() : () -> ()
    %cst_9 = arith.constant 0.353553385 : f32
    %25 = vector.broadcast %cst_9 : f32 to vector<4x8x8xf32>
    %26 = arith.mulf %24, %25 : vector<4x8x8xf32>
    %27 = tpu.iota {dimensions = array<i32: 0>} : vector<8x8xi32>
    %28 = tpu.iota {dimensions = array<i32: 1>} : vector<8x8xi32>
    %29 = arith.cmpi sle, %28, %27 : vector<8x8xi32>
    %30 = vector.shape_cast %29 : vector<8x8xi1> to vector<1x8x8xi1>
    %cst_10 = arith.constant -1.000000e+30 : f32
    %31 = vector.shape_cast %30 : vector<1x8x8xi1> to vector<1x8x8xi1>
    %32 = vector.broadcast %31 : vector<1x8x8xi1> to vector<4x8x8xi1>
    %33 = vector.broadcast %cst_10 : f32 to vector<4x8x8xf32>
    %34 = arith.select %32, %26, %33 : vector<4x8x8xi1>, vector<4x8x8xf32>
    %cst_11 = arith.constant dense<0xFF800000> : vector<4x8xf32>
    %35 = vector.multi_reduction <maximumf>, %34, %cst_11 [2] : vector<4x8x8xf32> to vector<4x8xf32>
    %36 = vector.shape_cast %35 : vector<4x8xf32> to vector<4x8x1xf32>
    %37 = vector.broadcast %36 : vector<4x8x1xf32> to vector<4x8x8xf32>
    %38 = arith.subf %34, %37 : vector<4x8x8xf32>
    %39 = math.exp %38 : vector<4x8x8xf32>
    %cst_12 = arith.constant dense<0.000000e+00> : vector<4x8xf32>
    %40 = vector.multi_reduction <add>, %39, %cst_12 [2] : vector<4x8x8xf32> to vector<4x8xf32>
    %41 = vector.shape_cast %40 : vector<4x8xf32> to vector<4x8x1xf32>
    %42 = tpu.reciprocal %41 {approx = true} : vector<4x8x1xf32> -> vector<4x8x1xf32>
    %43 = vector.broadcast %42 : vector<4x8x1xf32> to vector<4x8x8xf32>
    %44 = arith.mulf %39, %43 : vector<4x8x8xf32>
    %45 = arith.truncf %44 : vector<4x8x8xf32> to vector<4x8x8xbf16>
    "tpu.trace_start"() <{level = 10 : i32, message = "hqk,hkd->hqd"}> : () -> ()
    %cst_13 = arith.constant dense<0.000000e+00> : vector<4x8x8xf32>
    %46 = tpu.matmul %45, %23, %cst_13 {dimension_numbers = #tpu.dot_dimension_numbers<[2], [1], [1], [2], [0, 0, 0, 1, 1, 2], [0], [0]>} : vector<4x8x8xbf16>, vector<4x8x8xbf16>, vector<4x8x8xf32> -> vector<4x8x8xf32>
    "tpu.trace_stop"() : () -> ()
    %47 = tpu.transpose %46, [1, 0, 2] : vector<4x8x8xf32> -> vector<8x4x8xf32>
    %48 = vector.shape_cast %47 : vector<8x4x8xf32> to vector<8x32xf32>
    %49 = arith.truncf %48 : vector<8x32xf32> to vector<8x32xbf16>
    %c0_14 = arith.constant 0 : index
    %c0_15 = arith.constant 0 : index
    %c0_16 = arith.constant 0 : index
    %50 = vector.load %arg5[%c0_14, %c0_15, %c0_16] : memref<1x32x32xbf16, #tpu.memory_space<vmem>>, vector<1x32x32xbf16>
    %51 = vector.shape_cast %50 : vector<1x32x32xbf16> to vector<32x32xbf16>
    %cst_17 = arith.constant dense<0.000000e+00> : vector<8x32xf32>
    %52 = tpu.matmul %49, %51, %cst_17 {dimension_numbers = #tpu.dot_dimension_numbers<[1], [0], [0], [1], [0, 0, 1, 1], [], []>} : vector<8x32xbf16>, vector<32x32xbf16>, vector<8x32xf32> -> vector<8x32xf32>
    %c0_18 = arith.constant 0 : index
    %c0_19 = arith.constant 0 : index
    %c0_20 = arith.constant 0 : index
    %53 = vector.load %arg6[%c0_18, %c0_19, %c0_20] : memref<1x1x32xf32, #tpu.memory_space<vmem>>, vector<1x1x32xf32>
    %54 = vector.shape_cast %53 : vector<1x1x32xf32> to vector<1x32xf32>
    %55 = vector.broadcast %54 : vector<1x32xf32> to vector<8x32xf32>
    %56 = arith.addf %52, %55 : vector<8x32xf32>
    %57 = arith.addf %3, %56 : vector<8x32xf32>
    %c0_21 = arith.constant 0 : index
    %c0_22 = arith.constant 0 : index
    %c0_23 = arith.constant 0 : index
    %58 = vector.load %arg7[%c0_21, %c0_22, %c0_23] : memref<1x1x32xf32, #tpu.memory_space<vmem>>, vector<1x1x32xf32>
    %59 = vector.shape_cast %58 : vector<1x1x32xf32> to vector<1x32xf32>
    %c0_24 = arith.constant 0 : index
    %c0_25 = arith.constant 0 : index
    %c0_26 = arith.constant 0 : index
    %60 = vector.load %arg8[%c0_24, %c0_25, %c0_26] : memref<1x1x32xf32, #tpu.memory_space<vmem>>, vector<1x1x32xf32>
    %61 = vector.shape_cast %60 : vector<1x1x32xf32> to vector<1x32xf32>
    %cst_27 = arith.constant dense<0.000000e+00> : vector<8xf32>
    %62 = vector.multi_reduction <add>, %57, %cst_27 [1] : vector<8x32xf32> to vector<8xf32>
    %63 = vector.shape_cast %62 : vector<8xf32> to vector<8x1xf32>
    %cst_28 = arith.constant 3.200000e+01 : f32
    %64 = vector.broadcast %cst_28 : f32 to vector<8x1xf32>
    %65 = arith.divf %63, %64 : vector<8x1xf32>
    %66 = vector.broadcast %65 : vector<8x1xf32> to vector<8x32xf32>
    %67 = arith.subf %57, %66 : vector<8x32xf32>
    %68 = arith.mulf %67, %67 : vector<8x32xf32>
    %cst_29 = arith.constant dense<0.000000e+00> : vector<8xf32>
    %69 = vector.multi_reduction <add>, %68, %cst_29 [1] : vector<8x32xf32> to vector<8xf32>
    %70 = vector.shape_cast %69 : vector<8xf32> to vector<8x1xf32>
    %cst_30 = arith.constant 3.200000e+01 : f32
    %71 = vector.broadcast %cst_30 : f32 to vector<8x1xf32>
    %72 = arith.divf %70, %71 : vector<8x1xf32>
    %73 = vector.broadcast %65 : vector<8x1xf32> to vector<8x32xf32>
    %74 = arith.subf %57, %73 : vector<8x32xf32>
    %cst_31 = arith.constant 9.99999974E-6 : f32
    %75 = vector.broadcast %cst_31 : f32 to vector<8x1xf32>
    %76 = arith.addf %72, %75 : vector<8x1xf32>
    %77 = math.rsqrt %76 : vector<8x1xf32>
    %78 = vector.broadcast %77 : vector<8x1xf32> to vector<8x32xf32>
    %79 = arith.mulf %74, %78 : vector<8x32xf32>
    %80 = vector.broadcast %59 : vector<1x32xf32> to vector<8x32xf32>
    %81 = arith.mulf %79, %80 : vector<8x32xf32>
    %82 = vector.broadcast %61 : vector<1x32xf32> to vector<8x32xf32>
    %83 = arith.addf %81, %82 : vector<8x32xf32>
    %84 = arith.truncf %83 : vector<8x32xf32> to vector<8x32xbf16>
    %c0_32 = arith.constant 0 : index
    %c0_33 = arith.constant 0 : index
    %c0_34 = arith.constant 0 : index
    %85 = vector.load %arg9[%c0_32, %c0_33, %c0_34] : memref<1x32x64xbf16, #tpu.memory_space<vmem>>, vector<1x32x64xbf16>
    %86 = vector.shape_cast %85 : vector<1x32x64xbf16> to vector<32x64xbf16>
    %cst_35 = arith.constant dense<0.000000e+00> : vector<8x64xf32>
    %87 = tpu.matmul %84, %86, %cst_35 {dimension_numbers = #tpu.dot_dimension_numbers<[1], [0], [0], [1], [0, 0, 1, 1], [], []>} : vector<8x32xbf16>, vector<32x64xbf16>, vector<8x64xf32> -> vector<8x64xf32>
    %c0_36 = arith.constant 0 : index
    %c0_37 = arith.constant 0 : index
    %c0_38 = arith.constant 0 : index
    %88 = vector.load %arg10[%c0_36, %c0_37, %c0_38] : memref<1x1x64xf32, #tpu.memory_space<vmem>>, vector<1x1x64xf32>
    %89 = vector.shape_cast %88 : vector<1x1x64xf32> to vector<1x64xf32>
    %90 = vector.broadcast %89 : vector<1x64xf32> to vector<8x64xf32>
    %91 = arith.addf %87, %90 : vector<8x64xf32>
    %cst_39 = arith.constant 0.000000e+00 : f32
    %92 = vector.broadcast %cst_39 : f32 to vector<8x64xf32>
    %93 = arith.maximumf %91, %92 : vector<8x64xf32>
    %94 = arith.truncf %93 : vector<8x64xf32> to vector<8x64xbf16>
    %c0_40 = arith.constant 0 : index
    %c0_41 = arith.constant 0 : index
    %c0_42 = arith.constant 0 : index
    %95 = vector.load %arg11[%c0_40, %c0_41, %c0_42] : memref<1x64x32xbf16, #tpu.memory_space<vmem>>, vector<1x64x32xbf16>
    %96 = vector.shape_cast %95 : vector<1x64x32xbf16> to vector<64x32xbf16>
    %cst_43 = arith.constant dense<0.000000e+00> : vector<8x32xf32>
    %97 = tpu.matmul %94, %96, %cst_43 {dimension_numbers = #tpu.dot_dimension_numbers<[1], [0], [0], [1], [0, 0, 1, 1], [], []>} : vector<8x64xbf16>, vector<64x32xbf16>, vector<8x32xf32> -> vector<8x32xf32>
    %c0_44 = arith.constant 0 : index
    %c0_45 = arith.constant 0 : index
    %c0_46 = arith.constant 0 : index
    %98 = vector.load %arg12[%c0_44, %c0_45, %c0_46] : memref<1x1x32xf32, #tpu.memory_space<vmem>>, vector<1x1x32xf32>
    %99 = vector.shape_cast %98 : vector<1x1x32xf32> to vector<1x32xf32>
    %100 = vector.broadcast %99 : vector<1x32xf32> to vector<8x32xf32>
    %101 = arith.addf %97, %100 : vector<8x32xf32>
    %102 = arith.addf %83, %101 : vector<8x32xf32>
    %c0_47 = arith.constant 0 : index
    %c0_48 = arith.constant 0 : index
    %c0_49 = arith.constant 0 : index
    %103 = vector.load %arg13[%c0_47, %c0_48, %c0_49] : memref<1x1x32xf32, #tpu.memory_space<vmem>>, vector<1x1x32xf32>
    %104 = vector.shape_cast %103 : vector<1x1x32xf32> to vector<1x32xf32>
    %c0_50 = arith.constant 0 : index
    %c0_51 = arith.constant 0 : index
    %c0_52 = arith.constant 0 : index
    %105 = vector.load %arg14[%c0_50, %c0_51, %c0_52] : memref<1x1x32xf32, #tpu.memory_space<vmem>>, vector<1x1x32xf32>
    %106 = vector.shape_cast %105 : vector<1x1x32xf32> to vector<1x32xf32>
    %cst_53 = arith.constant dense<0.000000e+00> : vector<8xf32>
    %107 = vector.multi_reduction <add>, %102, %cst_53 [1] : vector<8x32xf32> to vector<8xf32>
    %108 = vector.shape_cast %107 : vector<8xf32> to vector<8x1xf32>
    %cst_54 = arith.constant 3.200000e+01 : f32
    %109 = vector.broadcast %cst_54 : f32 to vector<8x1xf32>
    %110 = arith.divf %108, %109 : vector<8x1xf32>
    %111 = vector.broadcast %110 : vector<8x1xf32> to vector<8x32xf32>
    %112 = arith.subf %102, %111 : vector<8x32xf32>
    %113 = arith.mulf %112, %112 : vector<8x32xf32>
    %cst_55 = arith.constant dense<0.000000e+00> : vector<8xf32>
    %114 = vector.multi_reduction <add>, %113, %cst_55 [1] : vector<8x32xf32> to vector<8xf32>
    %115 = vector.shape_cast %114 : vector<8xf32> to vector<8x1xf32>
    %cst_56 = arith.constant 3.200000e+01 : f32
    %116 = vector.broadcast %cst_56 : f32 to vector<8x1xf32>
    %117 = arith.divf %115, %116 : vector<8x1xf32>
    %118 = vector.broadcast %110 : vector<8x1xf32> to vector<8x32xf32>
    %119 = arith.subf %102, %118 : vector<8x32xf32>
    %cst_57 = arith.constant 9.99999974E-6 : f32
    %120 = vector.broadcast %cst_57 : f32 to vector<8x1xf32>
    %121 = arith.addf %117, %120 : vector<8x1xf32>
    %122 = math.rsqrt %121 : vector<8x1xf32>
    %123 = vector.broadcast %122 : vector<8x1xf32> to vector<8x32xf32>
    %124 = arith.mulf %119, %123 : vector<8x32xf32>
    %125 = vector.broadcast %104 : vector<1x32xf32> to vector<8x32xf32>
    %126 = arith.mulf %124, %125 : vector<8x32xf32>
    %127 = vector.broadcast %106 : vector<1x32xf32> to vector<8x32xf32>
    %128 = arith.addf %126, %127 : vector<8x32xf32>
    %c0_58 = arith.constant 0 : index
    %c0_59 = arith.constant 0 : index
    %129 = vector.load %arg16[%c0_58, %c0_59] : memref<8x32xf32, #tpu.memory_space<vmem>>, vector<8x32xf32>
    tpu.vector_store %arg16[%c0_58, %c0_59], %128 {strides = array<i32>} : memref<8x32xf32, #tpu.memory_space<vmem>>, vector<8x32xf32>,
    %c1_i32 = arith.constant 1 : i32
    %130 = arith.cmpi eq, %arg1, %c1_i32 : i32
    %131 = arith.extui %130 : i1 to i32
    %c0_i32_60 = arith.constant 0 : i32
    %132 = arith.cmpi ne, %131, %c0_i32_60 : i32
    scf.if %132 {
      %c0_61 = arith.constant 0 : index
      %c0_62 = arith.constant 0 : index
      %c0_63 = arith.constant 0 : index
      %133 = vector.load %arg15[%c0_61, %c0_62, %c0_63] : memref<1x8x32xf32, #tpu.memory_space<vmem>>, vector<1x8x32xf32>
      %134 = vector.shape_cast %133 : vector<1x8x32xf32> to vector<8x32xf32>
      %135 = vector.shape_cast %128 : vector<8x32xf32> to vector<1x8x32xf32>
      tpu.vector_store %arg15[%c0_61, %c0_62, %c0_63], %135 {strides = array<i32>} : memref<1x8x32xf32, #tpu.memory_space<vmem>>, vector<1x8x32xf32>,
    } else {
    }
    return
  }
  func.func @transform_0(%arg0: i32, %arg1: i32) -> (i32, i32, i32) {
    %c0_i32 = arith.constant 0 : i32
    %c0_i32_0 = arith.constant 0 : i32
    %c0_i32_1 = arith.constant 0 : i32
    return %arg0, %c0_i32, %c0_i32_0 : i32, i32, i32
  }
  func.func @transform_1(%arg0: i32, %arg1: i32) -> (i32, i32, i32) {
    %c0_i32 = arith.constant 0 : i32
    %c0_i32_0 = arith.constant 0 : i32
    %c0_i32_1 = arith.constant 0 : i32
    return %arg1, %c0_i32, %c0_i32_0 : i32, i32, i32
  }
  func.func @transform_2(%arg0: i32, %arg1: i32) -> (i32, i32, i32) {
    %c0_i32 = arith.constant 0 : i32
    %c0_i32_0 = arith.constant 0 : i32
    %c0_i32_1 = arith.constant 0 : i32
    return %arg1, %c0_i32, %c0_i32_0 : i32, i32, i32
  }
  func.func @transform_3(%arg0: i32, %arg1: i32) -> (i32, i32, i32) {
    %c0_i32 = arith.constant 0 : i32
    %c0_i32_0 = arith.constant 0 : i32
    %c0_i32_1 = arith.constant 0 : i32
    return %arg1, %c0_i32, %c0_i32_0 : i32, i32, i32
  }
  func.func @transform_4(%arg0: i32, %arg1: i32) -> (i32, i32, i32) {
    %c0_i32 = arith.constant 0 : i32
    %c0_i32_0 = arith.constant 0 : i32
    %c0_i32_1 = arith.constant 0 : i32
    return %arg1, %c0_i32, %c0_i32_0 : i32, i32, i32
  }
  func.func @transform_5(%arg0: i32, %arg1: i32) -> (i32, i32, i32) {
    %c0_i32 = arith.constant 0 : i32
    %c0_i32_0 = arith.constant 0 : i32
    %c0_i32_1 = arith.constant 0 : i32
    return %arg1, %c0_i32, %c0_i32_0 : i32, i32, i32
  }
  func.func @transform_6(%arg0: i32, %arg1: i32) -> (i32, i32, i32) {
    %c0_i32 = arith.constant 0 : i32
    %c0_i32_0 = arith.constant 0 : i32
    %c0_i32_1 = arith.constant 0 : i32
    return %arg1, %c0_i32, %c0_i32_0 : i32, i32, i32
  }
  func.func @transform_7(%arg0: i32, %arg1: i32) -> (i32, i32, i32) {
    %c0_i32 = arith.constant 0 : i32
    %c0_i32_0 = arith.constant 0 : i32
    %c0_i32_1 = arith.constant 0 : i32
    return %arg1, %c0_i32, %c0_i32_0 : i32, i32, i32
  }
  func.func @transform_8(%arg0: i32, %arg1: i32) -> (i32, i32, i32) {
    %c0_i32 = arith.constant 0 : i32
    %c0_i32_0 = arith.constant 0 : i32
    %c0_i32_1 = arith.constant 0 : i32
    return %arg1, %c0_i32, %c0_i32_0 : i32, i32, i32
  }
  func.func @transform_9(%arg0: i32, %arg1: i32) -> (i32, i32, i32) {
    %c0_i32 = arith.constant 0 : i32
    %c0_i32_0 = arith.constant 0 : i32
    %c0_i32_1 = arith.constant 0 : i32
    return %arg1, %c0_i32, %c0_i32_0 : i32, i32, i32
  }
  func.func @transform_10(%arg0: i32, %arg1: i32) -> (i32, i32, i32) {
    %c0_i32 = arith.constant 0 : i32
    %c0_i32_0 = arith.constant 0 : i32
    %c0_i32_1 = arith.constant 0 : i32
    return %arg1, %c0_i32, %c0_i32_0 : i32, i32, i32
  }
  func.func @transform_11(%arg0: i32, %arg1: i32) -> (i32, i32, i32) {
    %c0_i32 = arith.constant 0 : i32
    %c0_i32_0 = arith.constant 0 : i32
    %c0_i32_1 = arith.constant 0 : i32
    return %arg1, %c0_i32, %c0_i32_0 : i32, i32, i32
  }
  func.func @transform_12(%arg0: i32, %arg1: i32) -> (i32, i32, i32) {
    %c0_i32 = arith.constant 0 : i32
    %c0_i32_0 = arith.constant 0 : i32
    %c0_i32_1 = arith.constant 0 : i32
    return %arg1, %c0_i32, %c0_i32_0 : i32, i32, i32
  }
  func.func @transform_13(%arg0: i32, %arg1: i32) -> (i32, i32, i32) {
    %c0_i32 = arith.constant 0 : i32
    %c0_i32_0 = arith.constant 0 : i32
    %c0_i32_1 = arith.constant 0 : i32
    return %arg0, %c0_i32, %c0_i32_0 : i32, i32, i32
  }
}

</mosaic_0001>

<bundles_post_ra>
// kernel: tpu_custom_call.1
= control target key start
LH: loop header
LB: loop body
LE: loop exit
PB: predicated region body
PF: predicated region fallthrough
CT: control target
= control target key end

     0   :  { %s3256_s0 = inlined_call_operand.hbm [shape: f32[2,8,32], index: 0, kind: input, shape index: {}]   ;;  %s3257_s1 = inlined_call_operand.vmem [shape: bf16[2,32,96], index: 1, kind: input, shape index: {}]   ;;  %s3258_s2 = inlined_call_operand.vmem [shape: f32[2,1,96], index: 2, kind: input, shape index: {}]   ;;  %s3259_s3 = inlined_call_operand.vmem [shape: bf16[2,32,32], index: 3, kind: input, shape index: {}]   ;;  %s3260_s4 = inlined_call_operand.vmem [shape: f32[2,1,32], index: 4, kind: input, shape index: {}]   ;;  %s3261_s5 = inlined_call_operand.vmem [shape: f32[2,1,32], index: 5, kind: input, shape index: {}]   ;;  %s3262_s6 = inlined_call_operand.vmem [shape: f32[2,1,32], index: 6, kind: input, shape index: {}]   ;;  %s3263_s7 = inlined_call_operand.vmem [shape: bf16[2,32,64], index: 7, kind: input, shape index: {}]   ;;  %s3264_s8 = inlined_call_operand.vmem [shape: f32[2,1,64], index: 8, kind: input, shape index: {}]   ;;  %s3265_s9 = inlined_call_operand.vmem [shape: bf16[2,64,32], index: 9, kind: input, shape index: {}]   ;;  %s3266_s10 = inlined_call_operand.vmem [shape: f32[2,1,32], index: 10, kind: input, shape index: {}]   ;;  %s3267_s11 = inlined_call_operand.vmem [shape: f32[2,1,32], index: 11, kind: input, shape index: {}]   ;;  %s3268_s12 = inlined_call_operand.vmem [shape: f32[2,1,32], index: 12, kind: input, shape index: {}]   ;;  %s3269_s13 = inlined_call_operand.hbm [shape: f32[2,8,32], index: 13, kind: output, shape index: {}]  }
   0x1   :  { %3283 = sst [smem:[#allocation22_spill]] %s3256_s0 }
   0x2   :  { %3284 = sst [smem:[#allocation23_spill]] %s3257_s1 }
   0x3   :  { %3285 = sst [smem:[#allocation24_spill]] %s3259_s3 }
   0x4   :  { %3286 = sst [smem:[#allocation25_spill]] %s3262_s6 }
   0x5   :  { %3287 = sst [smem:[#allocation26_spill]] %s3263_s7 }
   0x6   :  { %3288 = sst [smem:[#allocation27_spill]] %s3266_s10 }
   0x7   :  { %3289 = sst [smem:[#allocation28_spill]] %s3267_s11 }
   0x8   :  { %3290 = sst [smem:[#allocation29_spill]] %s3268_s12 }
   0x9   :  { %3291 = sst [smem:[#allocation30_spill]] %s3269_s13 }
   0xa   :  { %18 = vsyncpa [#allocation4], 0 }
   0xb   :  { %20 = vsyncpa [#allocation4 + $0x1], 0 }
   0xc   :  { %21 = vsyncpa [#allocation5], 0 }
   0xd   :  { %23 = vsyncpa [#allocation5 + $0x1], 0  ;;  %s2787_s25 = smov 0   ;;  %s2789_s26 = smov 0  }
   0xe   :  { %s2791_s27 = smov 0   ;;  %s2793_s28 = smov 0  }
   0xf   :  { %s2795_s29 = smov 0   ;;  %s2797_s30 = smov 0  }
  0x10   :  { %s2799_s14 = smov 0   ;;  %s2801_s15 = smov 0  }
  0x11 LB: > { %3292 = sst [smem:[#allocation9_spill]] %s2673_s25  ;;  %s2278_s16 = sadd.s32 4294967295, %s2701_s15   ;;  %s2701_s15 = sphi %s2801_s15, %s29_s15   ;;  %s2697_s14 = sphi %s2799_s14, %s3340_s14   ;;  %s2693_s30 = sphi %s2797_s30, %s3339_s30   ;;  %s2689_s29 = sphi %s2795_s29, %s3338_s29   ;;  %s2685_s28 = sphi %s2793_s28, %s3337_s28   ;;  %s2681_s27 = sphi %s2791_s27, %s3336_s27   ;;  %s2677_s26 = sphi %s2789_s26, %s3335_s26   ;;  %s2673_s25 = sphi %s2787_s25, %s3334_s25  }
  0x12   : > { %3293 = sst [smem:[#allocation10_spill]] %s2677_s26  ;;  %s2279_s17 = sadd.s32 4294967294, %s2701_s15  }
  0x13   : > { %3294 = sst [smem:[#allocation11_spill]] %s2681_s27  ;;  %s38_s18 = sadd.s32 1, %s2693_s30 }
  0x14   : > { %3295 = sst [smem:[#allocation12_spill]] %s2689_s29  ;;  %s41_s19 = sadd.s32 1, %s2697_s14 }
  0x15   : > { %3296 = sst [smem:[#allocation13_spill]] %s2693_s30  ;;  %p39_p0 = scmp.ge.s32.totalorder %s38_s18, 2 }
  0x16   : > { %3297 = sst [smem:[#allocation14_spill]] %s2697_s14  ;;  %s48_s20 = sadd.s32 1, %s2681_s27 }
  0x17   : > { %3298 = sst [smem:[#allocation15_spill]] %s2701_s15  ;;  %p55_p1 = scmp.ne.s32.totalorder %s2681_s27, %s2677_s26 }
  0x18   : > { %p56_p2 = scmp.eq.s32.totalorder %s2701_s15, 0  ;;  %s3342_s18 = smov (%p39_p0, %s38_s18), 0 }
  0x19   : > { %3299 = sst [smem:[#allocation16_spill]] %s3342_s18  ;;  %s3344_s19 = smov (!%p39_p0, %s41_s19), %s2697_s14 }
  0x1a   : > { %p2838_p3 = por %p56_p2, %p55_p1  ;;  %p61_p4 = scmp.ne.s32.totalorder %s2677_s26, %s2673_s25 }
  0x1b   : > { %p43_p5 = scmp.ge.s32.totalorder %s3344_s19, 2  ;;  %p62_p6 = scmp.eq.s32.totalorder %s2278_s16, 0 }
  0x1c   : > { %p397_p7 = scmp.eq.s32.totalorder %s2278_s16, 3  ;;  %p403_p8 = scmp.eq.s32.totalorder %s2279_s17, 3 }
  0x1d   : > { %s3346_s19 = smov (%p43_p5, %s3344_s19), 0  ;;  %p2846_p9 = por %p62_p6, %p61_p4 }
  0x1e   : > { %3301 = sst [smem:[#allocation17_spill]] %s3346_s19  ;;  %p2850_p10 = por %p397_p7, %p55_p1 }
  0x1f   : > { %s45_s24 = ssub.s32 %s2697_s14, %s3346_s19  ;;  %p2856_p11 = por %p403_p8, %p61_p4 }
  0x20   : > { %s3303_s23 = scalar_select %p2850_p10, 1, 0 }
  0x21   : > { %s3305_s18 = scalar_select %p2856_p11, 1, 0 }
  0x22   : > { %3304 = sst [smem:[#allocation18_spill]] %s3303_s23  ;;  %p46_p12 = scmp.eq.s32.totalorder %s45_s24, 0 }
  0x23   : > { %3306 = sst [smem:[#allocation19_spill]] %s3305_s18  ;;  %p2469_p13 = scmp.lt.s32.totalorder %s2701_s15, 4 }
  0x24   : > { %s423_s16 = sand.u32 1, %s2681_s27   ;;  %s2283_s25 = sshll.u32 %s2697_s14, 7 }
  0x25   : > { %s2863_s17 = scalar_select %p46_p12, %s2681_s27, %s48_s20  }
  0x26   : > { %s2282_s30 = sshll.u32 %s423_s16, 3  ;;  %s3308_s0 = sld [smem:[#allocation22_spill]] }
  0x27   : > { %3307 = sst [smem:[#allocation20_spill]] %s2863_s17  ;;  %s427_s11 = scalar_lea.vmem [#allocation3], %s2282_s30 }
  0x28   : > { %s434_s10 = sshll.u32 %s427_s11, 4  ;;  %p2871_p0 = pnand %p2469_p13, %p2838_p3  ;;  %s435_s10 = int_to_ptr.vmem [resolvable:$true] %s434_s10 }
  0x29   : > { %p2284_p1 = scmp.ge.s32.totalorder %s2701_s15, 1  ;;  %p519_p2 = scmp.lt.s32.totalorder %s2701_s15, 5 }
  0x2a   : > { %s424_s24 = scalar_lea.sflag [#allocation4], %s423_s16  ;;  %p2579_p4 = pneg %p2871_p0 }
  0x2b   : > { %s2590_s20 = scalar_lea.vmem %s435_s10, 128  ;;  %s2703_s13 = smov [#allocation3]  }
  0x2c   : > { %s432_s12 = scalar_lea.hbm %s3308_s0, %s2283_s25  ;;  %p2591_p5 = scmp.ne.s32.totalorder %s435_s10, %s2590_s20 }
  0x2d   : > { %s2595_s25 = sshll.u32 %s2703_s13, 4  ;;  %s2596_s25 = int_to_ptr.vmem [resolvable:$false] %s2595_s25 }
  0x2e   : > { %p2593_p6 = pnand %p2591_p5, %p2579_p4  ;;  %s2597_s11 = scalar_lea.vmem %s2596_s25, 256 }
  0x2f   : > { %p2598_p8 = scmp.lt.s32.totalorder %s435_s10, %s2596_s25  ;;  %p2599_p12 = scmp.lt.s32.totalorder %s2597_s11, %s2590_s20 }
  0x30   : > { %p2594_p7 = pneg %p2593_p6 }
  0x31   : > { %p2600_p3 = por %p2599_p12, %p2598_p8 }
  0x33   : > { %p2601_p13 = pnand %p2600_p3, %p2594_p7 }
  0x35   : > { %2604 = shalt.err (!%p2601_p13)
}
  0x36   : > { %2464 = dma.hbm_to_vmem [thread:$0]  (!%p2871_p0), %s432_s12, 128, %s435_s10, %s424_s24  }
  0x37   : > { %p520_p11 = pnand %p2284_p1, %p519_p2 }
  0x39   : > { %523 = sbr.rel (%p520_p11) target bundleno = 2685 (0xa7d), region = 72 }
  0x3e   : > { %s2886_s29 = sand.u32 1, %s2677_s26  }
  0x3f   : > { %3310 = sst [smem:[#allocation21_spill]] %s2886_s29  ;;  %s2285_s30 = sshll.u32 %s2886_s29, 3 }
  0x40   : > { %s526_s21 = scalar_lea.sflag [#allocation4], %s2886_s29  ;;  %s529_s16 = scalar_lea.vmem [#allocation3], %s2285_s30 }
  0x41   : > { %2664 = dma.done.wait (%p2846_p9), %s526_s21, 128  }
  0x42   : > { %2666 = vsyncadd (%p2846_p9), %s526_s21, 4294967168  ;;  %p616_p0 = scmp.lt.s32.totalorder %s2685_s28, 1  ;;  %s3311_s1 = sld [smem:[#allocation23_spill]] }
  0x43   : > { %s3312_s3 = sld [smem:[#allocation24_spill]]  ;;  %s2950_s11 = scalar_lea.vmem [#allocation6], %s2285_s30 }
  0x44   : > { %s2896_s10 = scalar_select %p616_p0, %s2685_s28, 1 }
  0x45   : > { %s3314_s7 = sld [smem:[#allocation26_spill]]  ;;  %p2295_p9 = scmp.ne.s32.totalorder %s2685_s28, 0 }
  0x46   : > { %s2339_s12 = sshll.u32 %s2896_s10, 4  ;;  %s3315_s15 = sld [smem:[#allocation27_spill]] }
  0x47   : > { %s3316_s29 = sld [smem:[#allocation28_spill]] }
  0x48   : > { %s620_s25 = scalar_lea.vmem %s3311_s1, %s2339_s12  ;;  %s645_s1 = scalar_lea.vmem %s3264_s8, %s2896_s10 }
  0x49   : > { %s2909_s0 = scalar_lea.vmem %s3312_s3, %s2339_s12  ;;  %s2342_s3 = sshll.u32 %s2896_s10, 5 }
  0x4a   : > { %s2936_s27 = scalar_lea.vmem %s3265_s9, %s2342_s3 }
  0x4b   : > { %s2926_s13 = scalar_lea.vmem %s3314_s7, %s2339_s12  ;;  %s3317_s7 = sld [smem:[#allocation29_spill]] }
  0x4c   : > { %s653_s23 = scalar_lea.vmem %s3315_s15, %s2896_s10 }
  0x4d   : > { %s656_s22 = scalar_lea.vmem %s3316_s29, %s2896_s10  ;;  %664 = sbr.rel (%p2295_p9) target bundleno = 84 (0x54), region = 80 }
  0x51   : > { %s659_s6 = scalar_lea.vmem %s3317_s7, %s2896_s10 }
  0x52   : > { %v665_v0 = vld [vmem:[%s529_s16] sm:$0xff]  ;;  %vm666_vm0 = vcmask 261120  }
  0x53   : > { %667 = vst.msk [vmem:[#allocation2] sm:$0xff] %vm666_vm0, %v665_v0 }
  0x54 PF: > { %v2547_v1 = vld [vmem:[%s620_s25 + $0x8] sm:$0xff]   ;;  %v2704_v2 = vmov 0.0   ;;  %v2548_v3 = vld [vmem:[%s620_s25] sm:$0xff]   ;;  %vm2705_vm1 = vmmov 0   ;;  %vm693_vm2 = vcmask 261120   ;;  %s3318_s15 = scalar_lea.vmem %s3258_s2, %s2896_s10  ;;  %s2706_s29 = smov 104   ;;  %v752_v17 = vlaneseq }
  0x55   : > { %2373 = vmatprep.subr.bf16.mxu0 %v2704_v2  ;;  %2381 = vmatprep.subr.bf16.mxu1 %v2704_v2  ;;  %v2296_v6 = vld [vmem:[%s3318_s15] ss:$0 sm:$0xff]  ;;  %s2707_s30 = smov 120   ;;  %s2708_s16 = smov 96   ;;  %v2710_v15 = vmov 1983009808  }
  0x56   : > { %2374 = vmatpush3.bf16.msra.mxu0 %v2547_v1  ;;  %2377 = vmatprep.mubr.msk.bf16.mxu0 %vm2705_vm1, %v2704_v2  ;;  %s2709_s25 = smov 112   ;;  %v750_v16 = vunpack.c.l.s4 %v2710_v15  ;;  %v2989_v19 = vshrl.u32 %v752_v17, 7  ;;  %v2711_v20 = vmov 1934713408   ;;  %vm1191_vm3 = vcmask 64512   ;;  %s2712_s24 = smov 64  }
  0x57   : > { %2375 = vmatprep.subr.bf16.mxu0 %v2704_v2  ;;  %2383 = vmatprep.mubr.msk.bf16.mxu1 %vm2705_vm1, %v2704_v2  ;;  %v782_v21 = vunpack.c.l.s4 %v2711_v20  ;;  %vm1442_vm5 = vcmask 1043456   ;;  %s2714_s21 = smov 8   ;;  %s2715_s14 = smov 24   ;;  %vm1773_vm6 = vcmask 130048   ;;  %vm1775_vm7 = vcmask 195584  }
  0x58   : > { %v751_v18 = vunpack.c.0.s8 %v750_v16  ;;  %s3319_s18 = scalar_lea.vmem %s3260_s4, %s2896_s10  ;;  %s3320_s12 = scalar_lea.vmem %s3261_s5, %s2896_s10  ;;  %vm1983_vm8 = vcmask 523264  }
  0x59   : > { %v783_v27 = vunpack.c.0.s8 %v782_v21  ;;  %s3321_s7 = sld [smem:[#allocation25_spill]]  ;;  %p2334_p11 = scmp.ne.s32.totalorder %s2685_s28, 1 }
  0x5a   : > { %v2957_v4 = vld [vmem:[#allocation2] sm:$0xff]  ;;  %2376 = vmatpush3.bf16.msra.mxu0 %v2548_v3  ;;  %v2996_v24 = vsub.s32 %v751_v18, %v2989_v19 }
  0x5b   : > { %v669_v5 = vpack.c.bf16 %v2957_v4, %v2957_v4  ;;  %2387 = vmatprep.subr.bf16.mxu0 %v2704_v2  ;;  %v3007_v34 = vsub.s32 %v783_v27, %v2989_v19 }
  0x5d   : > { %2378 = vmatmul.mubr.msk.bf16.vlgmr.msra.gmra.mxu0 %vm693_vm2, %v669_v5 }
  0x5e   : > { %2389 = vmatprep.mubr.msk.bf16.mxu0 %vm2705_vm1, %v2704_v2 }
  0x5f   : > { %s3322_s15 = scalar_lea.vmem %s3321_s7, %s2896_s10 }
 0x11d   : > { %v731_v7 = vpop.f32.mrf.mxu0 }
 0x11e   : > { %v2973_v8 = vadd.f32 %v2296_v6, %v731_v7 }
 0x11f   : > { %v2379_v9 = vpop.f32.mrf.mxu0 }
 0x120   : > { %744 = vrot.lane.b32.xlu1 %v2973_v8, %s2706_s29  ;;  %738 = vrot.lane.b32.xlu0 %v2973_v8, %s2707_s30 }
 0x121   : > { %v734_v10 = vpop.f32.mrf.mxu0 }
 0x123   : > { %v2380_v11 = vpop.f32.mrf.mxu0 }
 0x124   : > { %815 = vrot.lane.b32.xlu1 %v2973_v8, %s2708_s16  ;;  %741 = vrot.lane.b32.xlu0 %v2973_v8, %s2709_s25 }
 0x192   : > { %v2979_v12 = vpop.permute.xlu0 %738  ;;  %v2982_v13 = vpop.permute.xlu1 %744 }
 0x193   : > { %817 = vrot.lane.b32.xlu0 %v2979_v12, %s2708_s16  ;;  %v763_v25 = vcombine.low %v2979_v12, %v2982_v13  ;;  %v764_v26 = vcombine.high %v2979_v12, %v2982_v13 }
 0x195   : > { %v771_v30 = vrot.slane %v763_v25, %v2996_v24  ;;  %v778_v31 = vrot.slane %v764_v26, %v2996_v24 }
 0x196   : > { %v2984_v14 = vpop.permute.xlu0 %741  ;;  %v816_v32 = vpop.permute.xlu1 %815 }
 0x197   : > { %821 = vrot.lane.b32.xlu0 %v2982_v13, %s2708_s16  ;;  %819 = vrot.lane.b32.xlu1 %v2984_v14, %s2708_s16  ;;  %v747_v22 = vcombine.low %v2973_v8, %v2984_v14  ;;  %v748_v23 = vcombine.high %v2973_v8, %v2984_v14 }
 0x199   : > { %v755_v28 = vrot.slane %v747_v22, %v2996_v24  ;;  %v762_v29 = vrot.slane %v748_v23, %v2996_v24 }
 0x19b   : > { %v779_v35 = vcombine.low %v755_v28, %v771_v30  ;;  %v780_v36 = vcombine.high %v755_v28, %v771_v30  ;;  %v795_v37 = vcombine.low %v762_v29, %v778_v31  ;;  %v796_v38 = vcombine.high %v762_v29, %v778_v31 }
 0x19d   : > { %v787_v45 = vrot.slane %v779_v35, %v3007_v34  ;;  %v794_v46 = vrot.slane %v780_v36, %v3007_v34  ;;  %v803_v47 = vrot.slane %v795_v37, %v3007_v34  ;;  %v810_v48 = vrot.slane %v796_v38, %v3007_v34 }
 0x19f   : > { %v975_v57 = vcombine.low %v787_v45, %v794_v46  ;;  %v2300_v58 = vcombine.high %v787_v45, %v794_v46  ;;  %v991_v59 = vcombine.low %v803_v47, %v810_v48  ;;  %v2301_v60 = vcombine.high %v803_v47, %v810_v48 }
 0x1a1   : > { %v982_v7 = vrot.slane %v975_v57, %v2996_v24  ;;  %v990_v9 = vrot.slane %v2300_v58, %v2996_v24  ;;  %v998_v10 = vrot.slane %v991_v59, %v2996_v24  ;;  %v1006_v11 = vrot.slane %v2301_v60, %v2996_v24 }
 0x1a2   : > { %v1383_v59 = vand.u32 127, %v752_v17 }
 0x1a3   : > { %v1007_v28 = vcombine.low %v982_v7, %v990_v9  ;;  %v1023_v29 = vcombine.low %v998_v10, %v1006_v11 }
 0x1a4   : > { %vm1384_vm4 = vcmp.le.s32.totalorder %v1383_v59, %v2989_v19 }
 0x1a5   : > { %v1015_v37 = vrot.slane %v1007_v28, %v3007_v34  ;;  %v1031_v38 = vrot.slane %v1023_v29, %v3007_v34 }
 0x1a7   : > { %v1039_v45 = vcombine.low %v1015_v37, %v1031_v38  ;;  %v1040_v46 = vcombine.high %v1015_v37, %v1031_v38 }
 0x205   : > { %v818_v33 = vpop.permute.xlu0 %817 }
 0x209   : > { %v820_v39 = vpop.permute.xlu1 %819  ;;  %v822_v40 = vpop.permute.xlu0 %821 }
 0x20a   : > { %v827_v41 = vcombine.low %v816_v32, %v820_v39  ;;  %v828_v42 = vcombine.high %v816_v32, %v820_v39  ;;  %v843_v43 = vcombine.low %v818_v33, %v822_v40  ;;  %v844_v44 = vcombine.high %v818_v33, %v822_v40 }
 0x20c   : > { %v835_v49 = vrot.slane %v827_v41, %v2996_v24  ;;  %v842_v50 = vrot.slane %v828_v42, %v2996_v24  ;;  %v851_v51 = vrot.slane %v843_v43, %v2996_v24  ;;  %v858_v52 = vrot.slane %v844_v44, %v2996_v24 }
 0x20d   : > { %v1008_v43 = vcombine.high %v982_v7, %v990_v9  ;;  %v1024_v44 = vcombine.high %v998_v10, %v1006_v11 }
 0x20e   : > { %v859_v53 = vcombine.low %v835_v49, %v851_v51  ;;  %v860_v54 = vcombine.high %v835_v49, %v851_v51  ;;  %v875_v55 = vcombine.low %v842_v50, %v858_v52  ;;  %v876_v56 = vcombine.high %v842_v50, %v858_v52 }
 0x20f   : > { %v1043_v49 = vpack.c.bf16 %v1039_v45, %v1039_v45  ;;  %v1044_v50 = vpack.c.bf16 %v1040_v46, %v1040_v46  ;;  %v1022_v51 = vrot.slane %v1008_v43, %v3007_v34  ;;  %v1038_v52 = vrot.slane %v1024_v44, %v3007_v34 }
 0x210   : > { %v867_v61 = vrot.slane %v859_v53, %v3007_v34  ;;  %v874_v62 = vrot.slane %v860_v54, %v3007_v34  ;;  %v883_v63 = vrot.slane %v875_v55, %v3007_v34  ;;  %v890_v0 = vrot.slane %v876_v56, %v3007_v34 }
 0x211   : > { %v1041_v55 = vcombine.low %v1022_v51, %v1038_v52  ;;  %v1042_v56 = vcombine.high %v1022_v51, %v1038_v52 }
 0x212   : > { %v1047_v1 = vcombine.low %v867_v61, %v874_v62  ;;  %v2302_v3 = vcombine.high %v867_v61, %v874_v62  ;;  %v1063_v5 = vcombine.low %v883_v63, %v890_v0  ;;  %v2303_v6 = vcombine.high %v883_v63, %v890_v0 }
 0x213   : > { %v1045_v57 = vpack.c.bf16 %v1041_v55, %v1041_v55  ;;  %v1046_v58 = vpack.c.bf16 %v1042_v56, %v1042_v56 }
 0x214   : > { %v1054_v15 = vrot.slane %v1047_v1, %v2996_v24  ;;  %v1062_v16 = vrot.slane %v2302_v3, %v2996_v24  ;;  %v1070_v18 = vrot.slane %v1063_v5, %v2996_v24  ;;  %v1078_v20 = vrot.slane %v2303_v6, %v2996_v24 }
 0x216   : > { %v1079_v21 = vcombine.low %v1054_v15, %v1062_v16  ;;  %v1095_v22 = vcombine.low %v1070_v18, %v1078_v20  ;;  %v1080_v23 = vcombine.high %v1054_v15, %v1062_v16  ;;  %v1096_v25 = vcombine.high %v1070_v18, %v1078_v20 }
 0x218   : > { %v1087_v26 = vrot.slane %v1079_v21, %v3007_v34  ;;  %v1103_v27 = vrot.slane %v1095_v22, %v3007_v34  ;;  %v1094_v32 = vrot.slane %v1080_v23, %v3007_v34  ;;  %v1110_v33 = vrot.slane %v1096_v25, %v3007_v34 }
 0x21a   : > { %v1111_v30 = vcombine.low %v1087_v26, %v1103_v27  ;;  %v1112_v31 = vcombine.high %v1087_v26, %v1103_v27  ;;  %v1113_v41 = vcombine.low %v1094_v32, %v1110_v33  ;;  %v1114_v42 = vcombine.high %v1094_v32, %v1110_v33 }
 0x21c   : > { %v1115_v35 = vpack.c.bf16 %v1111_v30, %v1111_v30  ;;  %v1116_v36 = vpack.c.bf16 %v1112_v31, %v1112_v31  ;;  %v1117_v47 = vpack.c.bf16 %v1113_v41, %v1113_v41  ;;  %v1118_v48 = vpack.c.bf16 %v1114_v42, %v1114_v42 }
 0x21e   : > { %v1196_v39 = vsel %vm1191_vm3, %v1115_v35, 0  ;;  %v1242_v40 = vsel %vm1191_vm3, %v1116_v36, 0  ;;  %v1288_v53 = vsel %vm1191_vm3, %v1117_v47, 0  ;;  %v1334_v54 = vsel %vm1191_vm3, %v1118_v48, 0 }
 0x21f   : > { %2382 = vmatpush3.bf16.xpose.msra.mxu1 %v1196_v39  ;;  %2388 = vmatpush3.bf16.xpose.msra.mxu0 %v1242_v40 }
 0x220   : > { %2393 = vmatprep.subr.bf16.mxu1 %v2704_v2  ;;  %2399 = vmatprep.subr.bf16.mxu0 %v2704_v2 }
 0x226   : > { %2384 = vmatmul.mubr.msk.bf16.vlgmr.msra.gmra.mxu1 %vm1191_vm3, %v1043_v49  ;;  %2390 = vmatmul.mubr.msk.bf16.vlgmr.msra.gmra.mxu0 %vm1191_vm3, %v1044_v50 }
 0x227   : > { %2394 = vmatpush3.bf16.xpose.msra.mxu1 %v1288_v53  ;;  %2400 = vmatpush3.bf16.xpose.msra.mxu0 %v1334_v54 }
 0x228   : > { %2395 = vmatprep.mubr.msk.bf16.mxu1 %vm2705_vm1, %v2704_v2  ;;  %2401 = vmatprep.mubr.msk.bf16.mxu0 %vm2705_vm1, %v2704_v2 }
 0x229   : > { %2405 = vmatprep.subr.bf16.mxu1 %v2704_v2  ;;  %2411 = vmatprep.subr.bf16.mxu0 %v2704_v2 }
 0x22e   : > { %2396 = vmatmul.mubr.msk.bf16.vlgmr.msra.gmra.mxu1 %vm1191_vm3, %v1045_v57  ;;  %2402 = vmatmul.mubr.msk.bf16.vlgmr.msra.gmra.mxu0 %vm1191_vm3, %v1046_v58 }
 0x22f   : > { %2407 = vmatprep.mubr.msk.bf16.mxu1 %vm2705_vm1, %v2704_v2  ;;  %2413 = vmatprep.mubr.msk.bf16.mxu0 %vm2705_vm1, %v2704_v2 }
 0x2e6   : > { %v1232_v60 = vpop.f32.mrf.mxu1  ;;  %v1278_v61 = vpop.f32.mrf.mxu0 }
 0x2e7   : > { %v1376_v62 = vmul.f32 0.35355338, %v1232_v60  ;;  %v1377_v63 = vmul.f32 0.35355338, %v1278_v61 }
 0x2e8   : > { %v2385_v0 = vpop.f32.mrf.mxu1  ;;  %v2391_v1 = vpop.f32.mrf.mxu0 }
 0x2e9   : > { %v1387_v3 = vsel %vm1384_vm4, %v1376_v62, -1e+30  ;;  %v1388_v5 = vsel %vm1384_vm4, %v1377_v63, -1e+30 }
 0x2ea   : > { %v1235_v6 = vpop.f32.mrf.mxu1  ;;  %v1281_v7 = vpop.f32.mrf.mxu0  ;;  %v1391_v9 = vsel %vm1191_vm3, %v1387_v3, -inf  ;;  %v1394_v17 = vsel %vm1191_vm3, %v1388_v5, -inf }
 0x2eb   : > { %1392 = vmax.xlane.f32.xlu1 %v1391_v9  ;;  %1395 = vmax.xlane.f32.xlu0 %v1394_v17 }
 0x2ec   : > { %v2386_v10 = vpop.f32.mrf.mxu1  ;;  %v2392_v11 = vpop.f32.mrf.mxu0 }
 0x2ee   : > { %v1324_v15 = vpop.f32.mrf.mxu1  ;;  %v1370_v16 = vpop.f32.mrf.mxu0 }
 0x2ef   : > { %v1378_v18 = vmul.f32 0.35355338, %v1324_v15  ;;  %v1379_v20 = vmul.f32 0.35355338, %v1370_v16 }
 0x2f0   : > { %v2397_v21 = vpop.f32.mrf.mxu1  ;;  %v2403_v22 = vpop.f32.mrf.mxu0 }
 0x2f1   : > { %v1389_v23 = vsel %vm1384_vm4, %v1378_v18, -1e+30  ;;  %v1390_v25 = vsel %vm1384_vm4, %v1379_v20, -1e+30 }
 0x2f2   : > { %v1327_v26 = vpop.f32.mrf.mxu1  ;;  %v1373_v27 = vpop.f32.mrf.mxu0  ;;  %v1397_v28 = vsel %vm1191_vm3, %v1389_v23, -inf  ;;  %v1400_v29 = vsel %vm1191_vm3, %v1390_v25, -inf }
 0x2f3   : > { %1398 = vmax.xlane.f32.xlu0 %v1397_v28  ;;  %1401 = vmax.xlane.f32.xlu1 %v1400_v29 }
 0x2f4   : > { %v2398_v30 = vpop.f32.mrf.mxu1  ;;  %v2404_v31 = vpop.f32.mrf.mxu0 }
 0x304   : > { %897 = vrot.lane.b32.xlu1 %v2979_v12, %s2712_s24 }
 0x309   : > { %895 = vrot.lane.b32.xlu0 %v2973_v8, %s2712_s24 }
 0x374   : > { %v1393_v32 = vpop.xlane.xlu1 %1392  ;;  %v1396_v33 = vpop.xlane.xlu0 %1395 }
 0x375   : > { %v1403_v35 = vsub.f32 %v1387_v3, %v1393_v32  ;;  %v1404_v19 = vsub.f32 %v1388_v5, %v1396_v33 }
 0x377   : > { %v1407_v36 = vmul.f32 1.442695, %v1403_v35  ;;  %v1409_v37 = vmul.f32 1.442695, %v1404_v19 }
 0x379   : > { %2557 = vpow2.f32 %v1407_v36 }
 0x37a   : > { %2559 = vpow2.f32 %v1409_v37 }
 0x37c   : > { %v1402_v8 = vpop.xlane.xlu1 %1401  ;;  %v1399_v41 = vpop.xlane.xlu0 %1398 }
 0x37d   : > { %v1406_v42 = vsub.f32 %v1390_v25, %v1402_v8  ;;  %v1405_v43 = vsub.f32 %v1389_v23, %v1399_v41 }
 0x37f   : > { %v1413_v44 = vmul.f32 1.442695, %v1406_v42  ;;  %v1411_v45 = vmul.f32 1.442695, %v1405_v43 }
 0x380   : > { %v898_v49 = vpop.permute.xlu1 %897 }
 0x381   : > { %2561 = vpow2.f32 %v1413_v44 }
 0x382   : > { %2563 = vpow2.f32 %v1411_v45 }
 0x386   : > { %v3073_v38 = vpop.eup %2557 }
 0x387   : > { %v3075_v39 = vpop.eup %2559  ;;  %v1415_v40 = vsel %vm1191_vm3, %v3073_v38, 0.0 }
 0x388   : > { %1416 = vadd.xlane.f32.xlu0 %v1415_v40  ;;  %v1418_v12 = vsel %vm1191_vm3, %v3075_v39, 0.0 }
 0x389   : > { %1419 = vadd.xlane.f32.xlu1 %v1418_v12 }
 0x38e   : > { %v3083_v46 = vpop.eup %2561 }
 0x38f   : > { %v3085_v47 = vpop.eup %2563  ;;  %v1424_v48 = vsel %vm1191_vm3, %v3083_v46, 0.0 }
 0x39a   : > { %899 = vrot.lane.b32.xlu1 %v2984_v14, %s2712_s24  ;;  %v1421_v14 = vsel %vm1191_vm3, %v3085_v47, 0.0 }
 0x39e   : > { %901 = vrot.lane.b32.xlu0 %v2982_v13, %s2712_s24  ;;  %v896_v13 = vpop.permute.xlu0 %895 }
 0x3bd   : > { %1425 = vadd.xlane.f32.xlu0 %v1424_v48 }
 0x3be   : > { %1422 = vadd.xlane.f32.xlu1 %v1421_v14 }
 0x411   : > { %v1417_v50 = vpop.xlane.xlu0 %1416 }
 0x412   : > { %v1420_v51 = vpop.xlane.xlu1 %1419  ;;  %2565 = vrcp.f32 %v1417_v50 }
 0x413   : > { %2567 = vrcp.f32 %v1420_v51 }
 0x415   : > { %v902_v52 = vpop.permute.xlu0 %901 }
 0x416   : > { %v923_v53 = vcombine.low %v898_v49, %v902_v52  ;;  %v924_v54 = vcombine.high %v898_v49, %v902_v52  ;;  %v900_v55 = vpop.permute.xlu1 %899 }
 0x417   : > { %v907_v56 = vcombine.low %v896_v13, %v900_v55  ;;  %v908_v57 = vcombine.high %v896_v13, %v900_v55 }
 0x418   : > { %v931_v58 = vrot.slane %v923_v53, %v2996_v24  ;;  %v938_v59 = vrot.slane %v924_v54, %v2996_v24 }
 0x419   : > { %v915_v60 = vrot.slane %v907_v56, %v2996_v24  ;;  %v922_v61 = vrot.slane %v908_v57, %v2996_v24 }
 0x41b   : > { %v939_v62 = vcombine.low %v915_v60, %v931_v58  ;;  %v940_v63 = vcombine.high %v915_v60, %v931_v58  ;;  %v955_v0 = vcombine.low %v922_v61, %v938_v59  ;;  %v956_v1 = vcombine.high %v922_v61, %v938_v59 }
 0x41d   : > { %v947_v3 = vrot.slane %v939_v62, %v3007_v34  ;;  %v954_v5 = vrot.slane %v940_v63, %v3007_v34  ;;  %v963_v6 = vrot.slane %v955_v0, %v3007_v34  ;;  %v970_v7 = vrot.slane %v956_v1, %v3007_v34 }
 0x41f   : > { %v1119_v9 = vcombine.low %v947_v3, %v954_v5  ;;  %v2304_v17 = vcombine.high %v947_v3, %v954_v5  ;;  %v1135_v10 = vcombine.low %v963_v6, %v970_v7  ;;  %v2305_v11 = vcombine.high %v963_v6, %v970_v7  ;;  %v2566_v26 = vpop.eup %2565 }
 0x420   : > { %v2568_v31 = vpop.eup %2567  ;;  %v1431_v40 = vmul.f32 %v2566_v26, %v3073_v38 }
 0x421   : > { %v1126_v15 = vrot.slane %v1119_v9, %v2996_v24  ;;  %v1134_v16 = vrot.slane %v2304_v17, %v2996_v24  ;;  %v1142_v18 = vrot.slane %v1135_v10, %v2996_v24  ;;  %v1150_v20 = vrot.slane %v2305_v11, %v2996_v24 }
 0x422   : > { %v1432_v12 = vmul.f32 %v2568_v31, %v3075_v39  ;;  %v1435_v44 = vpack.c.bf16 %v1431_v40, %v1431_v40 }
 0x423   : > { %v1151_v21 = vcombine.low %v1126_v15, %v1134_v16  ;;  %v1167_v22 = vcombine.low %v1142_v18, %v1150_v20  ;;  %v1152_v23 = vcombine.high %v1126_v15, %v1134_v16  ;;  %v1168_v25 = vcombine.high %v1142_v18, %v1150_v20 }
 0x424   : > { %v1436_v45 = vpack.c.bf16 %v1432_v12, %v1432_v12 }
 0x425   : > { %v1159_v27 = vrot.slane %v1151_v21, %v3007_v34  ;;  %v1175_v28 = vrot.slane %v1167_v22, %v3007_v34  ;;  %v1166_v29 = vrot.slane %v1152_v23, %v3007_v34  ;;  %v1182_v30 = vrot.slane %v1168_v25, %v3007_v34  ;;  %v2549_v22 = vld [vmem:[%s2909_s0 + $0x8] sm:$0xff]  }
 0x427   : > { %v1183_v32 = vcombine.low %v1159_v27, %v1175_v28  ;;  %v1184_v33 = vcombine.high %v1159_v27, %v1175_v28  ;;  %v1185_v35 = vcombine.low %v1166_v29, %v1182_v30  ;;  %v1186_v19 = vcombine.high %v1166_v29, %v1182_v30 }
 0x429   : > { %v1187_v36 = vpack.c.bf16 %v1183_v32, %v1183_v32  ;;  %v1188_v37 = vpack.c.bf16 %v1184_v33, %v1184_v33  ;;  %v1189_v42 = vpack.c.bf16 %v1185_v35, %v1185_v35  ;;  %v1190_v43 = vpack.c.bf16 %v1186_v19, %v1186_v19  ;;  %v2550_v33 = vld [vmem:[%s2909_s0] sm:$0xff]   ;;  %s2713_s0 = smov 16  }
 0x42b   : > { %v1444_v8 = vsel %vm1442_vm5, %v1187_v36, 0  ;;  %v1490_v41 = vsel %vm1442_vm5, %v1188_v37, 0  ;;  %v1536_v38 = vsel %vm1442_vm5, %v1189_v42, 0  ;;  %v1582_v39 = vsel %vm1442_vm5, %v1190_v43, 0 }
 0x42c   : > { %2406 = vmatpush3.bf16.msra.mxu1 %v1444_v8  ;;  %2412 = vmatpush3.bf16.msra.mxu0 %v1490_v41 }
 0x42d   : > { %2417 = vmatprep.subr.bf16.mxu1 %v2704_v2  ;;  %2423 = vmatprep.subr.bf16.mxu0 %v2704_v2 }
 0x42f   : > { %2408 = vmatmul.mubr.msk.bf16.vlgmr.msra.gmra.mxu1 %vm1191_vm3, %v1435_v44  ;;  %2414 = vmatmul.mubr.msk.bf16.vlgmr.msra.gmra.mxu0 %vm1191_vm3, %v1436_v45 }
 0x430   : > { %2418 = vmatpush3.bf16.msra.mxu1 %v1536_v38  ;;  %2424 = vmatpush3.bf16.msra.mxu0 %v1582_v39 }
 0x431   : > { %2419 = vmatprep.mubr.msk.bf16.mxu1 %vm2705_vm1, %v2704_v2  ;;  %2425 = vmatprep.mubr.msk.bf16.mxu0 %vm2705_vm1, %v2704_v2 }
 0x432   : > { %2429 = vmatprep.subr.bf16.mxu1 %v2704_v2  ;;  %2437 = vmatprep.subr.bf16.mxu0 %v2704_v2 }
 0x446   : > { %v1426_v48 = vpop.xlane.xlu0 %1425 }
 0x447   : > { %2569 = vrcp.f32 %v1426_v48  ;;  %v1423_v14 = vpop.xlane.xlu1 %1422 }
 0x448   : > { %2571 = vrcp.f32 %v1423_v14 }
 0x454   : > { %v2570_v13 = vpop.eup %2569 }
 0x455   : > { %v2572_v49 = vpop.eup %2571  ;;  %v1434_v50 = vmul.f32 %v2570_v13, %v3083_v46 }
 0x456   : > { %v1433_v51 = vmul.f32 %v2572_v49, %v3085_v47 }
 0x457   : > { %v1438_v52 = vpack.c.bf16 %v1434_v50, %v1434_v50 }
 0x458   : > { %v1437_v53 = vpack.c.bf16 %v1433_v51, %v1433_v51 }
 0x459   : > { %2426 = vmatmul.mubr.msk.bf16.vlgmr.msra.gmra.mxu0 %vm1191_vm3, %v1438_v52 }
 0x45a   : > { %2420 = vmatmul.mubr.msk.bf16.vlgmr.msra.gmra.mxu1 %vm1191_vm3, %v1437_v53  ;;  %2441 = vmatprep.mubr.msk.bf16.mxu0 %vm2705_vm1, %v2704_v2  ;;  %v2316_v53 = vld [vmem:[%s3319_s18] ss:$0 sm:$0xff] }
 0x45b   : > { %2433 = vmatprep.mubr.msk.bf16.mxu1 %vm2705_vm1, %v2704_v2  ;;  %2430 = vmatpush3.bf16.msra.mxu1 %v2549_v22  ;;  %v2322_v22 = vld [vmem:[%s645_s1] ss:$0 sm:$0xff] }
 0x45c   : > { %2431 = vmatprep.subr.bf16.mxu1 %v2704_v2 }
 0x45f   : > { %2432 = vmatpush3.bf16.msra.mxu1 %v2550_v33 }
 0x460   : > { %2445 = vmatprep.subr.bf16.mxu1 %v2704_v2 }
 0x4ef   : > { %v1480_v54 = vpop.f32.mrf.mxu1  ;;  %v1526_v55 = vpop.f32.mrf.mxu0 }
 0x4f1   : > { %v2409_v56 = vpop.f32.mrf.mxu1  ;;  %v2415_v57 = vpop.f32.mrf.mxu0 }
 0x4f3   : > { %v1483_v58 = vpop.f32.mrf.mxu1  ;;  %v1529_v46 = vpop.f32.mrf.mxu0 }
 0x4f5   : > { %v2410_v59 = vpop.f32.mrf.mxu1  ;;  %v2416_v47 = vpop.f32.mrf.mxu0 }
 0x519   : > { %v1618_v60 = vpop.f32.mrf.mxu0 }
 0x51a   : > { %v1572_v61 = vpop.f32.mrf.mxu1  ;;  %v1640_v62 = vcombine.low %v1526_v55, %v1618_v60  ;;  %v1641_v63 = vcombine.high %v1526_v55, %v1618_v60 }
 0x51b   : > { %v1624_v0 = vcombine.low %v1480_v54, %v1572_v61  ;;  %v1625_v1 = vcombine.high %v1480_v54, %v1572_v61  ;;  %v2427_v3 = vpop.f32.mrf.mxu0 }
 0x51c   : > { %v1648_v5 = vrot.slane %v1640_v62, %v2996_v24  ;;  %v1655_v6 = vrot.slane %v1641_v63, %v2996_v24  ;;  %v2421_v7 = vpop.f32.mrf.mxu1  ;;  %v2554_v3 = vld [vmem:[%s2936_s27 + $0x10] sm:$0xff]  }
 0x51d   : > { %v1632_v9 = vrot.slane %v1624_v0, %v2996_v24  ;;  %v1639_v17 = vrot.slane %v1625_v1, %v2996_v24  ;;  %v1621_v10 = vpop.f32.mrf.mxu0  ;;  %v2551_v0 = vld [vmem:[%s2926_s13 + $0x8] sm:$0xff]   ;;  %v2552_v1 = vld [vmem:[%s2926_s13] sm:$0xff]  }
 0x51e   : > { %v1575_v11 = vpop.f32.mrf.mxu1  ;;  %2438 = vmatpush3.bf16.msra.mxu0 %v2551_v0 }
 0x51f   : > { %v1656_v15 = vcombine.low %v1632_v9, %v1648_v5  ;;  %v1657_v16 = vcombine.high %v1632_v9, %v1648_v5  ;;  %v1672_v18 = vcombine.low %v1639_v17, %v1655_v6  ;;  %v1673_v20 = vcombine.high %v1639_v17, %v1655_v6  ;;  %v2428_v21 = vpop.f32.mrf.mxu0  ;;  %2439 = vmatprep.subr.bf16.mxu0 %v2704_v2  ;;  %v2320_v17 = vld [vmem:[%s3320_s12] ss:$0 sm:$0xff] }
 0x520   : > { %v2422_v23 = vpop.f32.mrf.mxu1  ;;  %v2321_v11 = vld [vmem:[%s3322_s15] ss:$0 sm:$0xff] }
 0x521   : > { %v1664_v25 = vrot.slane %v1656_v15, %v3007_v34  ;;  %v1671_v26 = vrot.slane %v1657_v16, %v3007_v34  ;;  %v1680_v27 = vrot.slane %v1672_v18, %v3007_v34  ;;  %v1687_v28 = vrot.slane %v1673_v20, %v3007_v34  ;;  %v2555_v20 = vld [vmem:[%s2936_s27 + $0x8] sm:$0xff]   ;;  %v2556_v21 = vld [vmem:[%s2936_s27] sm:$0xff]  }
 0x522   : > { %2440 = vmatpush3.bf16.msra.mxu0 %v2552_v1 }
 0x523   : > { %v1692_v29 = vcombine.low %v1664_v25, %v1671_v26  ;;  %v2314_v30 = vcombine.high %v1664_v25, %v1671_v26  ;;  %v1708_v31 = vcombine.low %v1680_v27, %v1687_v28  ;;  %v2315_v32 = vcombine.high %v1680_v27, %v1687_v28 }
 0x525   : > { %v1699_v35 = vrot.slane %v1692_v29, %v2996_v24  ;;  %v1707_v19 = vrot.slane %v2314_v30, %v2996_v24  ;;  %v1715_v36 = vrot.slane %v1708_v31, %v2996_v24  ;;  %v1723_v37 = vrot.slane %v2315_v32, %v2996_v24 }
 0x527   : > { %v1725_v40 = vcombine.high %v1699_v35, %v1707_v19  ;;  %v1741_v12 = vcombine.high %v1715_v36, %v1723_v37  ;;  %v1724_v8 = vcombine.low %v1699_v35, %v1707_v19  ;;  %v1740_v41 = vcombine.low %v1715_v36, %v1723_v37 }
 0x529   : > { %v1739_v42 = vrot.slane %v1725_v40, %v3007_v34  ;;  %v1755_v43 = vrot.slane %v1741_v12, %v3007_v34  ;;  %v1732_v44 = vrot.slane %v1724_v8, %v3007_v34  ;;  %v1748_v45 = vrot.slane %v1740_v41, %v3007_v34 }
 0x52b   : > { %v1758_v38 = vcombine.low %v1739_v42, %v1755_v43  ;;  %v1757_v39 = vcombine.high %v1732_v44, %v1748_v45  ;;  %v1756_v48 = vcombine.low %v1732_v44, %v1748_v45  ;;  %v1759_v24 = vcombine.high %v1739_v42, %v1755_v43 }
 0x52d   : > { %1765 = vrot.lane.b32.xlu1 %v1758_v38, %s2713_s0  ;;  %1761 = vrot.lane.b32.xlu0 %v1757_v39, %s2714_s21  ;;  %v2332_v39 = vld [vmem:[%s656_s22] ss:$0 sm:$0xff] }
 0x531   : > { %1769 = vrot.lane.b32.xlu1 %v1759_v24, %s2715_s14  ;;  %v2333_v24 = vld [vmem:[%s659_s6] ss:$0 sm:$0xff] }
 0x59f   : > { %v1766_v14 = vpop.permute.xlu1 %1765  ;;  %v1762_v13 = vpop.permute.xlu0 %1761 }
 0x5a0   : > { %v1772_v49 = vsel %vm1191_vm3, %v1756_v48, %v1762_v13 }
 0x5a1   : > { %v1774_v51 = vsel %vm1773_vm6, %v1772_v49, %v1766_v14 }
 0x5a3   : > { %v1770_v50 = vpop.permute.xlu1 %1769 }
 0x5a4   : > { %v1776_v34 = vsel %vm1775_vm7, %v1774_v51, %v1770_v50 }
 0x5a5   : > { %v1777_v52 = vpack.c.bf16 %v1776_v34, %v1776_v34 }
 0x5a7   : > { %2434 = vmatmul.mubr.msk.bf16.vlgmr.msra.gmra.mxu1 %vm693_vm2, %v1777_v52 }
 0x5a8   : > { %2453 = vmatprep.mubr.msk.bf16.mxu1 %vm2705_vm1, %v2704_v2 }
 0x667   : > { %v1838_v54 = vpop.f32.mrf.mxu1 }
 0x668   : > { %v1839_v55 = vadd.f32 %v2316_v53, %v1838_v54 }
 0x669   : > { %v2435_v56 = vpop.f32.mrf.mxu1 }
 0x66a   : > { %v1844_v57 = vadd.f32 %v1839_v55, %v2957_v4  ;;  %v2553_v4 = vld [vmem:[%s2936_s27 + $0x18] sm:$0xff]  }
 0x66b   : > { %v1841_v58 = vpop.f32.mrf.mxu1  ;;  %2446 = vmatpush3.bf16.msra.mxu1 %v2553_v4 }
 0x66c   : > { %v1847_v46 = vsel %vm693_vm2, %v1844_v57, 0.0  ;;  %2447 = vmatprep.subr.bf16.mxu1 %v2704_v2 }
 0x66d   : > { %1848 = vadd.xlane.f32.xlu0 %v1847_v46  ;;  %v2436_v59 = vpop.f32.mrf.mxu1 }
 0x66f   : > { %2448 = vmatpush3.bf16.msra.mxu1 %v2554_v3 }
 0x670   : > { %2449 = vmatprep.subr.bf16.mxu1 %v2704_v2 }
 0x673   : > { %2450 = vmatpush3.bf16.msra.mxu1 %v2555_v20 }
 0x674   : > { %2451 = vmatprep.subr.bf16.mxu1 %v2704_v2  ;;  %v2326_v2 = vld [vmem:[%s653_s23] ss:$0 sm:$0xff] }
 0x677   : > { %2452 = vmatpush3.bf16.msra.mxu1 %v2556_v21 }
 0x6f6   : > { %v1849_v47 = vpop.xlane.xlu0 %1848 }
 0x6f7   : > { %v1851_v60 = vmul.f32 0.03125, %v1849_v47 }
 0x6f9   : > { %v1852_v61 = vsub.f32 %v1844_v57, %v1851_v60 }
 0x6fb   : > { %v1853_v62 = vmul.f32 %v1852_v61, %v1852_v61 }
 0x6fd   : > { %v1854_v63 = vsel %vm693_vm2, %v1853_v62, 0.0 }
 0x6fe   : > { %1855 = vadd.xlane.f32.xlu1 %v1854_v63 }
 0x787   : > { %v1856_v5 = vpop.xlane.xlu1 %1855 }
 0x788   : > { %v1857_v6 = vmul.f32 0.03125, %v1856_v5 }
 0x78a   : > { %v1858_v7 = vadd.f32 1e-05, %v1857_v6 }
 0x78c   : > { %2573 = vrsqrt.f32 %v1858_v7 }
 0x799   : > { %v2574_v9 = vpop.eup %2573 }
 0x79a   : > { %v1860_v10 = vmul.f32 %v2574_v9, %v1852_v61 }
 0x79c   : > { %v1867_v15 = vmul.f32 %v2320_v17, %v1860_v10 }
 0x79e   : > { %v1874_v16 = vadd.f32 %v2321_v11, %v1867_v15 }
 0x7a0   : > { %v1875_v18 = vpack.c.bf16 %v1874_v16, %v1874_v16 }
 0x7a2   : > { %2442 = vmatmul.mubr.msk.bf16.vlgmr.msra.gmra.mxu0 %vm693_vm2, %v1875_v18 }
 0x862   : > { %v1936_v23 = vpop.f32.mrf.mxu0 }
 0x863   : > { %v1937_v25 = vadd.f32 %v2322_v22, %v1936_v23 }
 0x864   : > { %v2443_v26 = vpop.f32.mrf.mxu0 }
 0x865   : > { %v1942_v27 = vmax.f32 %v1937_v25, 0.0 }
 0x866   : > { %v1939_v28 = vpop.f32.mrf.mxu0 }
 0x867   : > { %v1943_v29 = vpack.c.bf16 %v1942_v27, %v1942_v27 }
 0x868   : > { %v2444_v30 = vpop.f32.mrf.mxu0 }
 0x869   : > { %2454 = vmatmul.mubr.msk.bf16.vlgmr.msra.gmra.mxu1 %vm1983_vm8, %v1943_v29 }
 0x929   : > { %v2021_v31 = vpop.f32.mrf.mxu1 }
 0x92a   : > { %v2022_v32 = vadd.f32 %v2326_v2, %v2021_v31 }
 0x92b   : > { %v2455_v33 = vpop.f32.mrf.mxu1 }
 0x92c   : > { %v2027_v35 = vadd.f32 %v2022_v32, %v1874_v16 }
 0x92d   : > { %v2024_v19 = vpop.f32.mrf.mxu1 }
 0x92e   : > { %v2030_v36 = vsel %vm693_vm2, %v2027_v35, 0.0 }
 0x92f   : > { %2031 = vadd.xlane.f32.xlu0 %v2030_v36  ;;  %v2456_v37 = vpop.f32.mrf.mxu1 }
 0x9b8   : > { %v2032_v40 = vpop.xlane.xlu0 %2031 }
 0x9b9   : > { %v2033_v12 = vmul.f32 0.03125, %v2032_v40 }
 0x9bb   : > { %v2034_v8 = vsub.f32 %v2027_v35, %v2033_v12 }
 0x9bd   : > { %v2035_v41 = vmul.f32 %v2034_v8, %v2034_v8 }
 0x9bf   : > { %v2036_v42 = vsel %vm693_vm2, %v2035_v41, 0.0 }
 0x9c0   : > { %2037 = vadd.xlane.f32.xlu0 %v2036_v42 }
 0xa49   : > { %v2038_v43 = vpop.xlane.xlu0 %2037 }
 0xa4a   : > { %v2039_v44 = vmul.f32 0.03125, %v2038_v43 }
 0xa4c   : > { %v2040_v45 = vadd.f32 1e-05, %v2039_v44 }
 0xa4e   : > { %2575 = vrsqrt.f32 %v2040_v45 }
 0xa5b   : > { %v2576_v38 = vpop.eup %2575 }
 0xa5c   : > { %v2042_v48 = vmul.f32 %v2576_v38, %v2034_v8 }
 0xa5e   : > { %v2049_v14 = vmul.f32 %v2332_v39, %v2042_v48  ;;  %2061 = sbr.rel (%p2334_p11) target bundleno = 2660 (0xa64), region = 84 }
 0xa60   : > { %v2056_v13 = vadd.f32 %v2333_v24, %v2049_v14 }
 0xa62   : > { %2057 = vst.msk [vmem:[#allocation2] sm:$0xff] %vm693_vm2, %v2056_v13 }
 0xa63   : > { %2062 = vst.msk [vmem:[%s2950_s11] sm:$0xff] %vm693_vm2, %v2056_v13 }
 0xa64 PF: > { %s3326_s17 = sld [smem:[#allocation12_spill]]  ;;  %s2077_s12 = sshll.u32 %s2950_s11, 4  ;;  %s2078_s12 = int_to_ptr.vmem [resolvable:$true] %s2077_s12 }
 0xa65   : > { %s3327_s22 = sld [smem:[#allocation21_spill]]  ;;  %s2605_s3 = scalar_lea.vmem %s2078_s12, 128 }
 0xa66   : > { %s3329_s10 = sld [smem:[#allocation30_spill]]  ;;  %p2606_p1 = scmp.ne.s32.totalorder %s2078_s12, %s2605_s3 }
 0xa67   : > { %s2716_s28 = smov [#allocation6]  }
 0xa68   : > { %p2607_p2 = pnand %p2606_p1, %p2850_p10  ;;  %s2609_s7 = sshll.u32 %s2716_s28, 4  ;;  %s2610_s7 = int_to_ptr.vmem [resolvable:$false] %s2609_s7 }
 0xa69   : > { %s2611_s15 = scalar_lea.vmem %s2610_s7, 256  ;;  %p2612_p5 = scmp.lt.s32.totalorder %s2078_s12, %s2610_s7 }
 0xa6a   : > { %s2336_s18 = sshll.u32 %s3326_s17, 7  ;;  %p2608_p4 = pneg %p2607_p2 }
 0xa6b   : > { %s2064_s20 = scalar_lea.sflag [#allocation5], %s3327_s22  ;;  %p2613_p6 = scmp.lt.s32.totalorder %s2611_s15, %s2605_s3 }
 0xa6c   : > { %s2075_s6 = scalar_lea.hbm %s3329_s10, %s2336_s18 }
 0xa6d   : > { %p2614_p7 = por %p2613_p6, %p2612_p5 }
 0xa6f   : > { %p2615_p8 = pnand %p2614_p7, %p2608_p4 }
 0xa71   : > { %2618 = shalt.err (!%p2615_p8)
}
 0xa72   : > { %s2619_s29 = scalar_lea.hbm %s2075_s6, 128  ;;  %s2623_s16 = scalar_lea.hbm %s3329_s10, 256 }
 0xa73   : > { %p2620_p12 = scmp.ne.s32.totalorder %s2075_s6, %s2619_s29  ;;  %p2624_p0 = scmp.lt.s32.totalorder %s2075_s6, %s3329_s10 }
 0xa74   : > { %p2625_p9 = scmp.lt.s32.totalorder %s2623_s16, %s2619_s29 }
 0xa75   : > { %p2621_p3 = pnand %p2620_p12, %p2850_p10 }
 0xa76   : > { %p2626_p11 = por %p2625_p9, %p2624_p0 }
 0xa77   : > { %p2622_p13 = pneg %p2621_p3 }
 0xa79   : > { %p2627_p1 = pnand %p2626_p11, %p2622_p13 }
 0xa7b   : > { %2630 = shalt.err (!%p2627_p1)
}
 0xa7c   : > { %2459 = dma.vmem_to_hbm [thread:$0]  (%p2850_p10), %s2078_s12, 128, %s2075_s6, %s2064_s20  }
 0xa7d PF: > { %s3330_s1 = sld [smem:[#allocation15_spill]] }
 0xa7e   : > { %s3331_s27 = sld [smem:[#allocation9_spill]] }
 0xa7f   : > { %s3332_s23 = sld [smem:[#allocation19_spill]] }
 0xa83   : > { %p2470_p2 = scmp.ge.s32.totalorder %s3330_s1, 2 }
 0xa84   : > { %s2089_s0 = sand.u32 1, %s3331_s27  }
 0xa85   : > { %p3333_p4 = scmp.ne.s32.totalorder %s3332_s23, 0  ;;  %s2090_s21 = scalar_lea.sflag [#allocation5], %s2089_s0 }
 0xa87   : > { %p2466_p5 = pnand %p2470_p2, %p3333_p4 }
 0xa89   : > { %p2467_p6 = pneg %p2466_p5 }
 0xa8b   : > { %2668 = dma.done.wait (%p2467_p6), %s2090_s21, 128  }
 0xa8c   : > { %2670 = vsyncadd (%p2467_p6), %s2090_s21, 4294967168  ;;  %s29_s15 = sadd.s32 1, %s3330_s1   ;;  %s3334_s25 = sld [smem:[#allocation10_spill]] }
 0xa8d   : > { %p26_p7 = scmp.ge.s32.totalorder %s29_s15, 6   ;;  %s3335_s26 = sld [smem:[#allocation11_spill]] }
 0xa8e   : > { %s3336_s27 = sld [smem:[#allocation20_spill]] }
 0xa8f   : > { %s3337_s28 = sld [smem:[#allocation13_spill]]  ;;  %28 = sbr.rel (!%p26_p7) target bundleno = 17 (0x11), region = 161 }
 0xa90   : > { %s3338_s29 = sld [smem:[#allocation14_spill]] }
 0xa91   : > { %s3339_s30 = sld [smem:[#allocation16_spill]] }
 0xa92   : > { %s3340_s14 = sld [smem:[#allocation17_spill]] }
 0xa94   :  { %2095 = vsyncpa [#allocation4], 1 }
 0xa95   :  { %2097 = vsyncpa [#allocation4 + $0x1], 1 }
 0xa96   :  { %2098 = vsyncpa [#allocation5], 1 }
 0xa97   :  { %2100 = vsyncpa [#allocation5 + $0x1], 1 }

</bundles_post_ra>
